<compile_context>
chip_gen: v6e
topology: v6e:2x2x1
jax: 0.10.0
libtpu: 0.0.40
codegen_flags: <defaults>
</compile_context>

<pallas_src>
import functools

import jax
import jax.numpy as jnp
from jax.experimental import pallas as pl
from jax.experimental.pallas import tpu as pltpu

LANE = 128  # native TPU lane width; all feature dims are padded to this.


def _round_up(x, m):
    return (x + m - 1) // m * m


def ego_agent_kernel(x_ref, w_ref, b_ref, out_ref, *, n_hidden_blocks):
    """Fused MLP: n_hidden_blocks x (Linear+foldedBN+ReLU) then final Linear.

    x_ref:  (tm, 128)        lane-padded activations for this batch tile
    w_ref:  (L, 128, 128)    packed, BN-folded, zero-padded weights (in, out)
    b_ref:  (L, 128)         packed, BN-folded, zero-padded biases
    out_ref:(tm, 128)        lane-dense output (real outputs in first D_OUTPUT lanes)
    """
    h = x_ref[...]
    for layer in range(n_hidden_blocks):
        z = jnp.dot(h, w_ref[layer], preferred_element_type=jnp.float32)
        z = z + b_ref[layer : layer + 1, :]
        h = jnp.maximum(z, 0.0)  # padded lanes stay exactly 0 (zero W cols / bias)
    last = n_hidden_blocks
    out = jnp.dot(h, w_ref[last], preferred_element_type=jnp.float32)
    out = out + b_ref[last : last + 1, :]
    out_ref[...] = out.astype(out_ref.dtype)


def fold_and_pack_params(flat_params):
    """Fold BN into each Linear and pack all layers into lane-dense slabs.

    flat_params layout: [W, b, scale, shift] per hidden block, then [W_last, b_last].
    Weights are (D_in, D_out); scale/shift/bias are (1, D_out).
    Returns (w_slab (L,128,128), b_slab (L,128)) zero-padded.
    """
    n_blocks = (len(flat_params) - 2) // 4
    ws, bs = [], []
    idx = 0
    for _ in range(n_blocks):
        w, b, scale, shift = flat_params[idx : idx + 4]
        idx += 4
        ws.append(w * scale)            # (D_in, D_out) * (1, D_out)
        bs.append(b * scale + shift)    # (1, D_out)
    ws.append(flat_params[idx])
    bs.append(flat_params[idx + 1])

    n_layers = len(ws)
    w_slab = jnp.zeros((n_layers, LANE, LANE), jnp.float32)
    b_slab = jnp.zeros((n_layers, LANE), jnp.float32)
    for layer, (w, b) in enumerate(zip(ws, bs)):
        d_in, d_out = w.shape
        w_slab = w_slab.at[layer, :d_in, :d_out].set(w)
        b_slab = b_slab.at[layer, :d_out].set(b[0])
    return w_slab, b_slab


def ego_agent_forward(x, flat_params, d_output, *, block_rows=512):
    B, d_in = x.shape
    n_hidden_blocks = (len(flat_params) - 2) // 4
    w_slab, b_slab = fold_and_pack_params(flat_params)
    n_layers = w_slab.shape[0]

    # Batch tiling: large row blocks (multiple of 8 sublanes), weights stay resident.
    tm = min(block_rows, _round_up(B, 8))
    b_pad = _round_up(B, tm)
    x_pad = jnp.zeros((b_pad, LANE), jnp.float32).at[:B, :d_in].set(x)

    kernel = functools.partial(ego_agent_kernel, n_hidden_blocks=n_hidden_blocks)
    out_pad = pl.pallas_call(
        kernel,
        out_shape=jax.ShapeDtypeStruct((b_pad, LANE), jnp.float32),
        grid_spec=pltpu.PrefetchScalarGridSpec(
            num_scalar_prefetch=0,
            grid=(b_pad // tm,),
            in_specs=[
                pl.BlockSpec((tm, LANE), lambda i: (i, 0)),          # x tile
                pl.BlockSpec((n_layers, LANE, LANE), lambda i: (0, 0, 0)),  # weights
                pl.BlockSpec((n_layers, LANE), lambda i: (0, 0)),    # biases
            ],
            out_specs=pl.BlockSpec((tm, LANE), lambda i: (i, 0)),
        ),
        compiler_params=pltpu.CompilerParams(
            dimension_semantics=("parallel",),  # shard batch tiles across TCs (v7x)
        ),
    )(x_pad, w_slab, b_slab)
    return out_pad[:B, :d_output]


def init_params(key, config):
    """Deterministic params matching the module's __init__ shapes.

    Flat list: [W, b, scale, shift] per (Linear+BN+ReLU) block, then
    [W_last, b_last].  scale = gamma / sqrt(var + eps), shift = beta - mean * scale
    (eval-mode BatchNorm1d with running statistics).
    """
    d_in = config["D_INPUT"]
    d_hid = config["D_HIDDEN"]
    d_out = config["D_OUTPUT"]
    n_layers = config.get("NUM_HIDDEN_LAYERS", 1)
    eps = 1e-5

    dims = [(d_in, d_hid)] + [(d_hid, d_hid)] * n_layers
    flat = []
    for di, do in dims:
        key, k_w, k_b, k_g, k_be, k_m, k_v = jax.random.split(key, 7)
        w = jax.random.normal(k_w, (di, do), jnp.float32) * 0.1  # (in, out)
        b = jax.random.normal(k_b, (1, do), jnp.float32) * 0.1
        gamma = 1.0 + 0.1 * jax.random.normal(k_g, (1, do), jnp.float32)
        beta = 0.1 * jax.random.normal(k_be, (1, do), jnp.float32)
        run_mean = 0.1 * jax.random.normal(k_m, (1, do), jnp.float32)
        run_var = jnp.abs(jax.random.normal(k_v, (1, do), jnp.float32)) + 0.5
        scale = gamma / jnp.sqrt(run_var + eps)
        shift = beta - run_mean * scale
        flat += [w, b, scale, shift]

    key, k_w, k_b = jax.random.split(key, 3)
    w_last = jax.random.normal(k_w, (d_hid, d_out), jnp.float32) * 0.1
    b_last = jax.random.normal(k_b, (1, d_out), jnp.float32) * 0.1
    flat += [w_last, b_last]
    return flat


def reference_forward(x, flat_params):
    """Plain-JAX reference of the same eval-mode forward pass (unfolded params)."""
    n_blocks = (len(flat_params) - 2) // 4
    h = x
    idx = 0
    for _ in range(n_blocks):
        w, b, s, sh = flat_params[idx : idx + 4]
        idx += 4
        h = jnp.maximum((h @ w + b) * s + sh, 0.0)
    w, b = flat_params[idx], flat_params[idx + 1]
    return h @ w + b


if __name__ == "__main__":
    config = {
        "DROPOUT": 0.1,
        "D_INPUT": 16,
        "D_HIDDEN": 32,
        "D_OUTPUT": 4,
        "NUM_HIDDEN_LAYERS": 1,
    }
    B = 8

    key = jax.random.PRNGKey(0)
    key, kx = jax.random.split(key)
    x = jax.random.normal(kx, (B, config["D_INPUT"]), jnp.float32)
    flat_params = init_params(key, config)

    out = ego_agent_forward(x, flat_params, config["D_OUTPUT"])
    out = jax.block_until_ready(out)

    ref = reference_forward(x, flat_params)
    assert out.shape == (B, config["D_OUTPUT"])
    assert jnp.allclose(out, ref, atol=1e-4, rtol=1e-4), "mismatch vs reference"
    print("KERNEL_OK")
</pallas_src>

<mosaic_0001>
module attributes {stable_mosaic.version = 11 : i64} {
  func.func @ego_agent_kernel(%arg0: i32, %arg1: memref<8x128xf32, #tpu.memory_space<vmem>>, %arg2: memref<3x128x128xf32, #tpu.memory_space<vmem>>, %arg3: memref<3x128xf32, #tpu.memory_space<vmem>>, %arg4: memref<8x128xf32, #tpu.memory_space<vmem>>) attributes {dimension_semantics = [#tpu.dimension_semantics<parallel>], iteration_bounds = array<i64: 1>, scalar_prefetch = 0 : i64, scratch_operands = 0 : i64, tpu.core_type = #tpu.core_type<tc>, window_params = [{transform_indices = @transform_0, window_bounds = array<i64: 8, 128>}, {pipeline_mode = #tpu.pipeline_mode<synchronous>, transform_indices = @transform_1, window_bounds = array<i64: 3, 128, 128>}, {pipeline_mode = #tpu.pipeline_mode<synchronous>, transform_indices = @transform_2, window_bounds = array<i64: 3, 128>}, {transform_indices = @transform_3, window_bounds = array<i64: 8, 128>}]} {
    %c0 = arith.constant 0 : index
    %c0_0 = arith.constant 0 : index
    %0 = vector.load %arg1[%c0, %c0_0] : memref<8x128xf32, #tpu.memory_space<vmem>>, vector<8x128xf32>
    %c0_1 = arith.constant 0 : index
    %c0_2 = arith.constant 0 : index
    %c0_3 = arith.constant 0 : index
    %1 = vector.load %arg2[%c0_1, %c0_2, %c0_3] : memref<3x128x128xf32, #tpu.memory_space<vmem>>, vector<1x128x128xf32>
    %2 = vector.shape_cast %1 : vector<1x128x128xf32> to vector<128x128xf32>
    %cst = arith.constant dense<0.000000e+00> : vector<8x128xf32>
    %3 = tpu.matmul %0, %2, %cst {dimension_numbers = #tpu.dot_dimension_numbers<[1], [0], [0], [1], [0, 0, 1, 1], [], []>} : vector<8x128xf32>, vector<128x128xf32>, vector<8x128xf32> -> vector<8x128xf32>
    %c0_4 = arith.constant 0 : index
    %c0_5 = arith.constant 0 : index
    %4 = vector.load %arg3[%c0_4, %c0_5] : memref<3x128xf32, #tpu.memory_space<vmem>>, vector<1x128xf32>
    %5 = vector.broadcast %4 : vector<1x128xf32> to vector<8x128xf32>
    %6 = arith.addf %3, %5 : vector<8x128xf32>
    %cst_6 = arith.constant 0.000000e+00 : f32
    %7 = vector.broadcast %cst_6 : f32 to vector<8x128xf32>
    %8 = arith.maximumf %6, %7 : vector<8x128xf32>
    %c1 = arith.constant 1 : index
    %c0_7 = arith.constant 0 : index
    %c0_8 = arith.constant 0 : index
    %9 = vector.load %arg2[%c1, %c0_7, %c0_8] : memref<3x128x128xf32, #tpu.memory_space<vmem>>, vector<1x128x128xf32>
    %10 = vector.shape_cast %9 : vector<1x128x128xf32> to vector<128x128xf32>
    %cst_9 = arith.constant dense<0.000000e+00> : vector<8x128xf32>
    %11 = tpu.matmul %8, %10, %cst_9 {dimension_numbers = #tpu.dot_dimension_numbers<[1], [0], [0], [1], [0, 0, 1, 1], [], []>} : vector<8x128xf32>, vector<128x128xf32>, vector<8x128xf32> -> vector<8x128xf32>
    %c1_10 = arith.constant 1 : index
    %c0_11 = arith.constant 0 : index
    %12 = vector.load %arg3[%c1_10, %c0_11] : memref<3x128xf32, #tpu.memory_space<vmem>>, vector<1x128xf32>
    %13 = vector.broadcast %12 : vector<1x128xf32> to vector<8x128xf32>
    %14 = arith.addf %11, %13 : vector<8x128xf32>
    %cst_12 = arith.constant 0.000000e+00 : f32
    %15 = vector.broadcast %cst_12 : f32 to vector<8x128xf32>
    %16 = arith.maximumf %14, %15 : vector<8x128xf32>
    %c2 = arith.constant 2 : index
    %c0_13 = arith.constant 0 : index
    %c0_14 = arith.constant 0 : index
    %17 = vector.load %arg2[%c2, %c0_13, %c0_14] : memref<3x128x128xf32, #tpu.memory_space<vmem>>, vector<1x128x128xf32>
    %18 = vector.shape_cast %17 : vector<1x128x128xf32> to vector<128x128xf32>
    %cst_15 = arith.constant dense<0.000000e+00> : vector<8x128xf32>
    %19 = tpu.matmul %16, %18, %cst_15 {dimension_numbers = #tpu.dot_dimension_numbers<[1], [0], [0], [1], [0, 0, 1, 1], [], []>} : vector<8x128xf32>, vector<128x128xf32>, vector<8x128xf32> -> vector<8x128xf32>
    %c2_16 = arith.constant 2 : index
    %c0_17 = arith.constant 0 : index
    %20 = vector.load %arg3[%c2_16, %c0_17] : memref<3x128xf32, #tpu.memory_space<vmem>>, vector<1x128xf32>
    %21 = vector.broadcast %20 : vector<1x128xf32> to vector<8x128xf32>
    %22 = arith.addf %19, %21 : vector<8x128xf32>
    %c0_18 = arith.constant 0 : index
    %c0_19 = arith.constant 0 : index
    %23 = vector.load %arg4[%c0_18, %c0_19] : memref<8x128xf32, #tpu.memory_space<vmem>>, vector<8x128xf32>
    tpu.vector_store %arg4[%c0_18, %c0_19], %22 {strides = array<i32>} : memref<8x128xf32, #tpu.memory_space<vmem>>, vector<8x128xf32>,
    return
  }
  func.func @transform_0(%arg0: i32) -> (i32, i32) {
    %c0_i32 = arith.constant 0 : i32
    %c0_i32_0 = arith.constant 0 : i32
    return %arg0, %c0_i32 : i32, i32
  }
  func.func @transform_1(%arg0: i32) -> (i32, i32, i32) {
    %c0_i32 = arith.constant 0 : i32
    %c0_i32_0 = arith.constant 0 : i32
    %c0_i32_1 = arith.constant 0 : i32
    %c0_i32_2 = arith.constant 0 : i32
    return %c0_i32, %c0_i32_0, %c0_i32_1 : i32, i32, i32
  }
  func.func @transform_2(%arg0: i32) -> (i32, i32) {
    %c0_i32 = arith.constant 0 : i32
    %c0_i32_0 = arith.constant 0 : i32
    %c0_i32_1 = arith.constant 0 : i32
    return %c0_i32, %c0_i32_0 : i32, i32
  }
  func.func @transform_3(%arg0: i32) -> (i32, i32) {
    %c0_i32 = arith.constant 0 : i32
    %c0_i32_0 = arith.constant 0 : i32
    return %arg0, %c0_i32 : i32, i32
  }
}

</mosaic_0001>

<bundles_post_ra>
// kernel: tpu_custom_call.1
= control target key start
LH: loop header
LB: loop body
LE: loop exit
PB: predicated region body
PF: predicated region fallthrough
CT: control target
= control target key end

     0   :  { %8 = vsyncpa [#allocation3], 0  ;;  %s694_s0 = inlined_call_operand.hbm [shape: f32[8,128], index: 0, kind: input, shape index: {}]   ;;  %s695_s1 = inlined_call_operand.hbm [shape: f32[3,128,128], index: 1, kind: input, shape index: {}]   ;;  %s696_s2 = inlined_call_operand.hbm [shape: f32[3,128], index: 2, kind: input, shape index: {}]   ;;  %s697_s3 = inlined_call_operand.hbm [shape: f32[8,128], index: 3, kind: output, shape index: {}]  }
   0x1   :  { %9 = vsyncpa [#allocation6], 0 }
   0x2   :  { %10 = vsyncpa [#allocation4], 0  ;;  %s600_s12 = smov [#allocation5]  }
   0x3   :  { %s26_s13 = sshll.u32 %s600_s12, 4  ;;  %s27_s13 = int_to_ptr.vmem [resolvable:$true] %s26_s13 }
   0x4   :  { %s522_s14 = scalar_lea.vmem %s27_s13, 6144  ;;  %p527_p1 = scmp.lt.s32.totalorder %s27_s13, %s27_s13 }
   0x5   :  { %p523_p0 = scmp.ne.s32.totalorder %s27_s13, %s522_s14  ;;  %p528_p2 = scmp.lt.s32.totalorder %s522_s14, %s522_s14 }
   0x7   :  { %p529_p3 = por %p528_p2, %p527_p1 }
   0x9   :  { %p530_p4 = pnand %p529_p3, %p523_p0 }
   0xb   :  { %533 = shalt.err (!%p530_p4)
}
   0xc   :  { %s601_s15 = smov 128   ;;  %s602_s16 = smov 8  }
   0xd   :  { %32 = dma.hbm_to_vmem [thread:$0]  %s695_s1, 6144, %s27_s13, [#allocation6], %s601_s15, %s601_s15, %s602_s16  }
   0xe   :  { %s603_s19 = smov [#allocation2]   ;;  %s604_s21 = smov [#allocation7]  }
   0xf   :  { %s17_s20 = sshll.u32 %s603_s19, 4  ;;  %s39_s22 = sshll.u32 %s604_s21, 4  ;;  %s18_s20 = int_to_ptr.vmem [resolvable:$true] %s17_s20  ;;  %s40_s22 = int_to_ptr.vmem [resolvable:$true] %s39_s22 }
  0x10   :  { %s542_s23 = scalar_lea.vmem %s18_s20, 128  ;;  %p547_p6 = scmp.lt.s32.totalorder %s18_s20, %s18_s20 }
  0x11   :  { %p543_p5 = scmp.ne.s32.totalorder %s18_s20, %s542_s23  ;;  %p548_p7 = scmp.lt.s32.totalorder %s542_s23, %s542_s23 }
  0x13   :  { %p549_p8 = por %p548_p7, %p547_p6 }
  0x15   :  { %p550_p9 = pnand %p549_p8, %p543_p5 }
  0x17   :  { %553 = shalt.err (!%p550_p9)
}
  0x18   :  { %20 = dma.hbm_to_vmem [thread:$0]  %s694_s0, 128, %s18_s20, [#allocation3]  }
  0x19   :  { %s562_s26 = scalar_lea.vmem %s40_s22, 64  ;;  %p567_p11 = scmp.lt.s32.totalorder %s40_s22, %s40_s22 }
  0x1a   :  { %p563_p10 = scmp.ne.s32.totalorder %s40_s22, %s562_s26  ;;  %p568_p12 = scmp.lt.s32.totalorder %s562_s26, %s562_s26 }
  0x1c   :  { %p569_p13 = por %p568_p12, %p567_p11 }
  0x1e   :  { %p570_p0 = pnand %p569_p13, %p563_p10 }
  0x20   :  { %573 = shalt.err (!%p570_p0)
}
  0x21   :  { %42 = dma.hbm_to_vmem [thread:$0]  %s696_s2, 64, %s40_s22, [#allocation6]  }
  0x22   :  { %594 = dma.done.wait [#allocation3], 128  }
  0x23   :  { %595 = vsyncadd [#allocation3], 4294967168 }
  0x24   :  { %596 = dma.done.wait [#allocation6], 6208  }
  0x25   :  { %597 = vsyncadd [#allocation6], 4294961088  ;;  %v605_v0 = vmov 0.0   ;;  %vm606_vm0 = vmmov 0   ;;  %v68_v1 = vld [vmem:[#allocation5 + $0x78] sm:$0xff]  ;;  %v67_v2 = vld [vmem:[#allocation5 + $0x70] sm:$0xff] }
  0x26   :  { %401 = vmatprep.subr.mxu0 %v605_v0  ;;  %433 = vmatprep.mubr.msk.f32.mxu0 %vm606_vm0, %v605_v0  ;;  %v66_v3 = vld [vmem:[#allocation5 + $0x68] sm:$0xff]  ;;  %v65_v4 = vld [vmem:[#allocation5 + $0x60] sm:$0xff]  ;;  %v161_v5 = vld [vmem:[#allocation5 + $0xf8] sm:$0xff]  ;;  %s607_s0 = smov [#allocation8]  }
  0x27   :  { %436 = vmatprep.subr.mxu1 %v605_v0  ;;  %468 = vmatprep.mubr.msk.f32.mxu1 %vm606_vm0, %v605_v0  ;;  %v64_v6 = vld [vmem:[#allocation5 + $0x58] sm:$0xff]  ;;  %v160_v7 = vld [vmem:[#allocation5 + $0xf0] sm:$0xff]  ;;  %v159_v8 = vld [vmem:[#allocation5 + $0xe8] sm:$0xff]  ;;  %s337_s2 = sshll.u32 %s607_s0, 4  ;;  %s338_s2 = int_to_ptr.vmem [resolvable:$true] %s337_s2 }
  0x28   :  { %402 = vmatpush3.msra.mxu0 %v68_v1  ;;  %437 = vmatpush3.msra.mxu1 %v161_v5  ;;  %v63_v9 = vld [vmem:[#allocation5 + $0x50] sm:$0xff]  ;;  %v158_v10 = vld [vmem:[#allocation5 + $0xe0] sm:$0xff]  ;;  %v62_v11 = vld [vmem:[#allocation5 + $0x48] sm:$0xff]  ;;  %s574_s28 = scalar_lea.vmem %s338_s2, 128  ;;  %p579_p2 = scmp.lt.s32.totalorder %s338_s2, %s338_s2 }
  0x29   :  { %403 = vmatprep.subr.mxu0 %v605_v0  ;;  %438 = vmatprep.subr.mxu1 %v605_v0  ;;  %v157_v12 = vld [vmem:[#allocation5 + $0xd8] sm:$0xff]  ;;  %v61_v13 = vld [vmem:[#allocation5 + $0x40] sm:$0xff]  ;;  %v156_v14 = vld [vmem:[#allocation5 + $0xd0] sm:$0xff]  ;;  %p575_p1 = scmp.ne.s32.totalorder %s338_s2, %s574_s28  ;;  %p580_p3 = scmp.lt.s32.totalorder %s574_s28, %s574_s28 }
  0x2a   :  { %404 = vmatpush3.msra.mxu0 %v67_v2  ;;  %439 = vmatpush3.msra.mxu1 %v160_v7  ;;  %v60_v15 = vld [vmem:[#allocation5 + $0x38] sm:$0xff]  ;;  %v155_v16 = vld [vmem:[#allocation5 + $0xc8] sm:$0xff]  ;;  %v59_v17 = vld [vmem:[#allocation5 + $0x30] sm:$0xff] }
  0x2b   :  { %405 = vmatprep.subr.mxu0 %v605_v0  ;;  %440 = vmatprep.subr.mxu1 %v605_v0  ;;  %v154_v18 = vld [vmem:[#allocation5 + $0xc0] sm:$0xff]  ;;  %v58_v19 = vld [vmem:[#allocation5 + $0x28] sm:$0xff]  ;;  %v153_v20 = vld [vmem:[#allocation5 + $0xb8] sm:$0xff]  ;;  %p581_p4 = por %p580_p3, %p579_p2 }
  0x2c   :  { %406 = vmatpush3.msra.mxu0 %v66_v3  ;;  %441 = vmatpush3.msra.mxu1 %v159_v8  ;;  %v57_v21 = vld [vmem:[#allocation5 + $0x20] sm:$0xff]  ;;  %v152_v22 = vld [vmem:[#allocation5 + $0xb0] sm:$0xff]  ;;  %v56_v23 = vld [vmem:[#allocation5 + $0x18] sm:$0xff] }
  0x2d   :  { %407 = vmatprep.subr.mxu0 %v605_v0  ;;  %442 = vmatprep.subr.mxu1 %v605_v0  ;;  %v151_v24 = vld [vmem:[#allocation5 + $0xa8] sm:$0xff]  ;;  %v55_v25 = vld [vmem:[#allocation5 + $0x10] sm:$0xff]  ;;  %v150_v26 = vld [vmem:[#allocation5 + $0xa0] sm:$0xff]  ;;  %p582_p5 = pnand %p581_p4, %p575_p1 }
  0x2e   :  { %408 = vmatpush3.msra.mxu0 %v65_v4  ;;  %443 = vmatpush3.msra.mxu1 %v158_v10  ;;  %v54_v27 = vld [vmem:[#allocation5 + $0x8] sm:$0xff]  ;;  %v149_v28 = vld [vmem:[#allocation5 + $0x98] sm:$0xff]  ;;  %v53_v29 = vld [vmem:[#allocation5] sm:$0xff] }
  0x2f   :  { %409 = vmatprep.subr.mxu0 %v605_v0  ;;  %444 = vmatprep.subr.mxu1 %v605_v0  ;;  %v52_v30 = vld [vmem:[#allocation2] sm:$0xff]  ;;  %v148_v31 = vld [vmem:[#allocation5 + $0x90] sm:$0xff]  ;;  %v147_v32 = vld [vmem:[#allocation5 + $0x88] sm:$0xff] }
  0x30   :  { %410 = vmatpush3.msra.mxu0 %v64_v6  ;;  %445 = vmatpush3.msra.mxu1 %v157_v12  ;;  %v146_v33 = vld [vmem:[#allocation5 + $0x80] sm:$0xff]  ;;  %v254_v34 = vld [vmem:[#allocation5 + $0x178] sm:$0xff]  ;;  %v253_v35 = vld [vmem:[#allocation5 + $0x170] sm:$0xff] }
  0x31   :  { %411 = vmatprep.subr.mxu0 %v605_v0  ;;  %446 = vmatprep.subr.mxu1 %v605_v0  ;;  %v252_v36 = vld [vmem:[#allocation5 + $0x168] sm:$0xff]  ;;  %v251_v37 = vld [vmem:[#allocation5 + $0x160] sm:$0xff]  ;;  %v250_v38 = vld [vmem:[#allocation5 + $0x158] sm:$0xff] }
  0x32   :  { %412 = vmatpush3.msra.mxu0 %v63_v9  ;;  %447 = vmatpush3.msra.mxu1 %v156_v14  ;;  %v249_v39 = vld [vmem:[#allocation5 + $0x150] sm:$0xff]  ;;  %v248_v40 = vld [vmem:[#allocation5 + $0x148] sm:$0xff]  ;;  %v247_v41 = vld [vmem:[#allocation5 + $0x140] sm:$0xff] }
  0x33   :  { %413 = vmatprep.subr.mxu0 %v605_v0  ;;  %448 = vmatprep.subr.mxu1 %v605_v0  ;;  %v246_v42 = vld [vmem:[#allocation5 + $0x138] sm:$0xff]  ;;  %v245_v43 = vld [vmem:[#allocation5 + $0x130] sm:$0xff]  ;;  %v244_v44 = vld [vmem:[#allocation5 + $0x128] sm:$0xff] }
  0x34   :  { %414 = vmatpush3.msra.mxu0 %v62_v11  ;;  %449 = vmatpush3.msra.mxu1 %v155_v16  ;;  %v243_v45 = vld [vmem:[#allocation5 + $0x120] sm:$0xff]  ;;  %v242_v46 = vld [vmem:[#allocation5 + $0x118] sm:$0xff]  ;;  %v241_v52 = vld [vmem:[#allocation5 + $0x110] sm:$0xff] }
  0x35   :  { %415 = vmatprep.subr.mxu0 %v605_v0  ;;  %450 = vmatprep.subr.mxu1 %v605_v0  ;;  %v347_v47 = vld [vmem:[#allocation7] ss:$0 sm:$0xff]  ;;  %v240_v53 = vld [vmem:[#allocation5 + $0x108] sm:$0xff]  ;;  %v348_v55 = vld [vmem:[#allocation7 + $0x1] ss:$0 sm:$0xff] }
  0x36   :  { %416 = vmatpush3.msra.mxu0 %v61_v13  ;;  %451 = vmatpush3.msra.mxu1 %v154_v18  ;;  %v239_v54 = vld [vmem:[#allocation5 + $0x100] sm:$0xff] }
  0x37   :  { %417 = vmatprep.subr.mxu0 %v605_v0  ;;  %452 = vmatprep.subr.mxu1 %v605_v0  ;;  %v349_v60 = vld [vmem:[#allocation7 + $0x2] ss:$0 sm:$0xff] }
  0x38   :  { %418 = vmatpush3.msra.mxu0 %v60_v15  ;;  %453 = vmatpush3.msra.mxu1 %v153_v20 }
  0x39   :  { %419 = vmatprep.subr.mxu0 %v605_v0  ;;  %454 = vmatprep.subr.mxu1 %v605_v0 }
  0x3a   :  { %420 = vmatpush3.msra.mxu0 %v59_v17  ;;  %455 = vmatpush3.msra.mxu1 %v152_v22 }
  0x3b   :  { %421 = vmatprep.subr.mxu0 %v605_v0  ;;  %456 = vmatprep.subr.mxu1 %v605_v0 }
  0x3c   :  { %422 = vmatpush3.msra.mxu0 %v58_v19  ;;  %457 = vmatpush3.msra.mxu1 %v151_v24 }
  0x3d   :  { %423 = vmatprep.subr.mxu0 %v605_v0  ;;  %458 = vmatprep.subr.mxu1 %v605_v0 }
  0x3e   :  { %424 = vmatpush3.msra.mxu0 %v57_v21  ;;  %459 = vmatpush3.msra.mxu1 %v150_v26 }
  0x3f   :  { %425 = vmatprep.subr.mxu0 %v605_v0  ;;  %460 = vmatprep.subr.mxu1 %v605_v0 }
  0x40   :  { %426 = vmatpush3.msra.mxu0 %v56_v23  ;;  %461 = vmatpush3.msra.mxu1 %v149_v28 }
  0x41   :  { %427 = vmatprep.subr.mxu0 %v605_v0  ;;  %462 = vmatprep.subr.mxu1 %v605_v0 }
  0x42   :  { %428 = vmatpush3.msra.mxu0 %v55_v25  ;;  %463 = vmatpush3.msra.mxu1 %v148_v31 }
  0x43   :  { %429 = vmatprep.subr.mxu0 %v605_v0  ;;  %464 = vmatprep.subr.mxu1 %v605_v0 }
  0x44   :  { %430 = vmatpush3.msra.mxu0 %v54_v27  ;;  %465 = vmatpush3.msra.mxu1 %v147_v32 }
  0x45   :  { %431 = vmatprep.subr.mxu0 %v605_v0  ;;  %466 = vmatprep.subr.mxu1 %v605_v0 }
  0x46   :  { %432 = vmatpush3.msra.mxu0 %v53_v29  ;;  %467 = vmatpush3.msra.mxu1 %v146_v33 }
  0x47   :  { %434 = vmatmul.mubr.f32.vlgmr.msra.gmra.mxu0 %v52_v30  ;;  %471 = vmatprep.subr.mxu0 %v605_v0 }
  0x48   :  { %503 = vmatprep.mubr.msk.f32.mxu0 %vm606_vm0, %v605_v0  ;;  %472 = vmatpush3.msra.mxu0 %v254_v34 }
  0x49   :  { %473 = vmatprep.subr.mxu0 %v605_v0 }
  0x4a   :  { %474 = vmatpush3.msra.mxu0 %v253_v35 }
  0x4b   :  { %475 = vmatprep.subr.mxu0 %v605_v0 }
  0x4c   :  { %476 = vmatpush3.msra.mxu0 %v252_v36 }
  0x4d   :  { %477 = vmatprep.subr.mxu0 %v605_v0 }
  0x4e   :  { %478 = vmatpush3.msra.mxu0 %v251_v37 }
  0x4f   :  { %479 = vmatprep.subr.mxu0 %v605_v0 }
  0x50   :  { %480 = vmatpush3.msra.mxu0 %v250_v38 }
  0x51   :  { %481 = vmatprep.subr.mxu0 %v605_v0 }
  0x52   :  { %482 = vmatpush3.msra.mxu0 %v249_v39 }
  0x53   :  { %483 = vmatprep.subr.mxu0 %v605_v0 }
  0x54   :  { %484 = vmatpush3.msra.mxu0 %v248_v40 }
  0x55   :  { %485 = vmatprep.subr.mxu0 %v605_v0 }
  0x56   :  { %486 = vmatpush3.msra.mxu0 %v247_v41 }
  0x57   :  { %487 = vmatprep.subr.mxu0 %v605_v0 }
  0x58   :  { %488 = vmatpush3.msra.mxu0 %v246_v42 }
  0x59   :  { %489 = vmatprep.subr.mxu0 %v605_v0 }
  0x5a   :  { %490 = vmatpush3.msra.mxu0 %v245_v43 }
  0x5b   :  { %491 = vmatprep.subr.mxu0 %v605_v0 }
  0x5c   :  { %492 = vmatpush3.msra.mxu0 %v244_v44 }
  0x5d   :  { %493 = vmatprep.subr.mxu0 %v605_v0 }
  0x5e   :  { %494 = vmatpush3.msra.mxu0 %v243_v45 }
  0x5f   :  { %495 = vmatprep.subr.mxu0 %v605_v0 }
  0x60   :  { %496 = vmatpush3.msra.mxu0 %v242_v46 }
  0x61   :  { %497 = vmatprep.subr.mxu0 %v605_v0 }
  0x62   :  { %498 = vmatpush3.msra.mxu0 %v241_v52 }
  0x63   :  { %499 = vmatprep.subr.mxu0 %v605_v0 }
  0x64   :  { %500 = vmatpush3.msra.mxu0 %v240_v53 }
  0x65   :  { %501 = vmatprep.subr.mxu0 %v605_v0 }
  0x66   :  { %502 = vmatpush3.msra.mxu0 %v239_v54 }
 0x107   :  { %v140_v48 = vpop.f32.mrf.mxu0 }
 0x108   :  { %v141_v49 = vadd.f32 %v347_v47, %v140_v48 }
 0x109   :  { %v435_v50 = vpop.f32.mrf.mxu0 }
 0x10a   :  { %v144_v51 = vmax.f32 %v141_v49, 0.0 }
 0x10c   :  { %469 = vmatmul.mubr.f32.vlgmr.msra.gmra.mxu1 %v144_v51 }
 0x1cc   :  { %v233_v56 = vpop.f32.mrf.mxu1 }
 0x1cd   :  { %v234_v57 = vadd.f32 %v348_v55, %v233_v56 }
 0x1ce   :  { %v470_v58 = vpop.f32.mrf.mxu1 }
 0x1cf   :  { %v237_v59 = vmax.f32 %v234_v57, 0.0 }
 0x1d1   :  { %504 = vmatmul.mubr.f32.vlgmr.msra.gmra.mxu0 %v237_v59 }
 0x291   :  { %v326_v61 = vpop.f32.mrf.mxu0 }
 0x292   :  { %v327_v62 = vadd.f32 %v349_v60, %v326_v61 }
 0x293   :  { %v505_v63 = vpop.f32.mrf.mxu0 }
 0x294   :  { %330 = vst [vmem:[#allocation8] sm:$0xff] %v327_v62 }
 0x295   :  { %585 = shalt.err (!%p582_p5)
}
 0x296   :  { %340 = dma.vmem_to_hbm [thread:$0]  %s338_s2, 128, %s697_s3, [#allocation4]  }
 0x297   :  { %598 = dma.done.wait [#allocation4], 128  }
 0x298   :  { %599 = vsyncadd [#allocation4], 4294967168 }
 0x299   :  { %344 = vsyncpa [#allocation3], 1 }
 0x29a   :  { %345 = vsyncpa [#allocation6], 1 }
 0x29b   :  { %346 = vsyncpa [#allocation4], 1 }

</bundles_post_ra>
